<compile_context>
chip_gen: v7x
topology: tpu7x:2x2x1
jax: 0.10.0
libtpu: 0.0.40
codegen_flags: <defaults>
</compile_context>

<pallas_src>
import functools

import jax
import jax.numpy as jnp
from jax import lax
from jax.experimental import pallas as pl
from jax.experimental.pallas import tpu as pltpu

BN_EPS = 1e-5


def _round_up(x, m):
    return (x + m - 1) // m * m


def _vmem_budget_bytes():
    """Scoped-VMEM budget derived from the actual part (v5e/v6e: 128 MiB, v7x: 64 MiB)."""
    try:
        physical = int(pltpu.get_tpu_info().vmem_capacity_bytes)
    except Exception:  # not on TPU / query unavailable -> be conservative
        physical = 64 << 20
    return min(physical * 3 // 4, 96 << 20)   # 48 MiB on 64 MiB parts, 96 MiB on 128 MiB parts


def _choose_tile_rows(n_rows, kp, cp, out_bytes, vmem_budget):
    """Row-tile size budgeted against the larger pass (pass 2: x tile + out tile, 2x buffered)."""
    per_row = 2 * (kp * 2) + 2 * (cp * out_bytes)          # double-buffered bf16 x + out
    target = max(vmem_budget // 3, 1 << 20)                # headroom for weights / compiler scratch
    tr = target // max(per_row, 1)
    tr = max(16, min(tr, 4096))
    tr = (tr // 16) * 16                                    # bf16 sublane packing
    rp16 = _round_up(n_rows, 16)
    tr = min(tr, rp16)
    # Megacore (v7x): make sure small inputs still produce >= 2 grid steps.
    if tr >= rp16 and rp16 >= 32:
        tr = max(16, _round_up(rp16 // 2, 16))
    return tr


def _stats_kernel(x_ref, w_ref, stats_ref):
    """Pass 1 (one row tile): per-channel sum / sumsq of conv = x @ w (f32 acc). Stats only."""
    acc = jnp.dot(x_ref[...], w_ref[...], preferred_element_type=jnp.float32)  # (TR, Cp) f32
    stats_ref[0:1, :] = jnp.sum(acc, axis=0, keepdims=True)        # rows 2..7 never read
    stats_ref[1:2, :] = jnp.sum(acc * acc, axis=0, keepdims=True)


def _conv_affine_relu_kernel(x_ref, w_ref, scale_ref, shift_ref, out_ref):
    """Pass 2 (one row tile): recompute conv, fuse BN affine + ReLU."""
    acc = jnp.dot(x_ref[...], w_ref[...], preferred_element_type=jnp.float32)  # (TR, Cp) f32
    out_ref[...] = jnp.maximum(acc * scale_ref[...] + shift_ref[...], 0.0).astype(out_ref.dtype)


@functools.partial(jax.jit, static_argnames=("compute_dtype", "out_dtype"))
def compact_layer_forward(x_ncl, w_oik, b, gamma, beta,
                          compute_dtype=jnp.bfloat16, out_dtype=jnp.float32):
    """x_ncl: (N, Cin, L) PyTorch NCL layout. Returns (N, Cout, L) float32."""
    del b  # conv bias cancels exactly under training-mode BatchNorm (mean-subtracted out)

    N, Cin, L = x_ncl.shape
    Cout = w_oik.shape[0]
    K = 3 * Cin                               # im2col contraction dim
    Kp = _round_up(K, 16)                     # clean bf16 sublane packing for the weight block
    R = N * L                                 # flattened output rows
    Cp = _round_up(Cout, 128)                 # lane-dense output channels

    out_bytes = jnp.dtype(out_dtype).itemsize
    vmem_budget = _vmem_budget_bytes()
    TR = _choose_tile_rows(R, Kp, Cp, out_bytes, vmem_budget)
    num_tiles = pl.cdiv(R, TR)
    Rp = num_tiles * TR

    # ---- wrapper-side layout glue (plain JAX) --------------------------------
    x_nlc = jnp.transpose(x_ncl, (0, 2, 1))                          # (N, L, Cin)
    x_pad = jnp.pad(x_nlc, ((0, 0), (1, 1), (0, 0)))                 # (N, L+2, Cin)
    # im2col taps [l-1, l, l+1], tap-major along the channel axis.
    x_im2col = jnp.concatenate(
        [x_pad[:, 0:L, :], x_pad[:, 1:L + 1, :], x_pad[:, 2:L + 2, :]], axis=-1)
    x_rows = x_im2col.reshape(R, K).astype(compute_dtype)
    x_rows = jnp.pad(x_rows, ((0, Rp - R), (0, Kp - K)))             # (Rp, Kp) zero-padded

    # conv weight (Cout, Cin, 3) -> (3, Cin, Cout) -> (K, Cout) -> (Kp, Cp)
    w_kc = jnp.transpose(w_oik, (2, 1, 0)).reshape(K, Cout)
    w_kc = jnp.pad(w_kc, ((0, Kp - K), (0, Cp - Cout))).astype(compute_dtype)

    # ---- pass 1: stats-only (no conv intermediate written to HBM) ------------
    stats = pl.pallas_call(
        _stats_kernel,
        out_shape=jax.ShapeDtypeStruct((num_tiles * 8, Cp), jnp.float32),
        grid=(num_tiles,),
        in_specs=[
            pl.BlockSpec((TR, Kp), lambda i: (i, 0)),
            pl.BlockSpec((Kp, Cp), lambda i: (0, 0)),
        ],
        out_specs=pl.BlockSpec((8, Cp), lambda i: (i, 0)),
        compiler_params=pltpu.CompilerParams(
            dimension_semantics=("parallel",),
            vmem_limit_bytes=vmem_budget),
    )(x_rows, w_kc)

    # ---- tiny cross-tile stats reduction + BN affine folding (plain JAX) -----
    stats = stats.reshape(num_tiles, 8, Cp)
    total_sum = jnp.sum(stats[:, 0, :], axis=0)                      # (Cp,)
    total_sumsq = jnp.sum(stats[:, 1, :], axis=0)                    # (Cp,)
    count = jnp.float32(R)                                           # padded rows contribute 0
    mean = total_sum / count
    var = jnp.maximum(total_sumsq / count - mean * mean, 0.0)        # biased var (BN train mode)
    gamma_p = jnp.pad(gamma.astype(jnp.float32), (0, Cp - Cout))
    beta_p = jnp.pad(beta.astype(jnp.float32), (0, Cp - Cout))
    scale_vec = gamma_p * lax.rsqrt(var + BN_EPS)
    shift_vec = beta_p - mean * scale_vec
    scale = scale_vec.reshape(1, Cp)
    shift = shift_vec.reshape(1, Cp)

    # ---- pass 2: recompute conv, fused per-channel scale/shift + ReLU --------
    y = pl.pallas_call(
        _conv_affine_relu_kernel,
        out_shape=jax.ShapeDtypeStruct((Rp, Cp), out_dtype),
        grid=(num_tiles,),
        in_specs=[
            pl.BlockSpec((TR, Kp), lambda i: (i, 0)),
            pl.BlockSpec((Kp, Cp), lambda i: (0, 0)),
            pl.BlockSpec((1, Cp), lambda i: (0, 0)),
            pl.BlockSpec((1, Cp), lambda i: (0, 0)),
        ],
        out_specs=pl.BlockSpec((TR, Cp), lambda i: (i, 0)),
        compiler_params=pltpu.CompilerParams(
            dimension_semantics=("parallel",),
            vmem_limit_bytes=vmem_budget),
    )(x_rows, w_kc, scale, shift)

    # strip padding, back to PyTorch NCL layout
    y = y[:R, :Cout].astype(jnp.float32).reshape(N, L, Cout)
    return jnp.transpose(y, (0, 2, 1))                               # (N, Cout, L)


def reference_forward(x_ncl, w_oik, b, gamma, beta):
    """Independent pure-JAX f32 reference matching PyTorch Conv1d + BN(train) + ReLU."""
    y = lax.conv_general_dilated(
        x_ncl, w_oik, window_strides=(1,), padding=((1, 1),),
        dimension_numbers=("NCH", "OIH", "NCH"))
    y = y + b[None, :, None]
    mean = jnp.mean(y, axis=(0, 2), keepdims=True)
    var = jnp.mean((y - mean) ** 2, axis=(0, 2), keepdims=True)  # biased, as in BN train mode
    y = (y - mean) / jnp.sqrt(var + BN_EPS)
    y = y * gamma[None, :, None] + beta[None, :, None]
    return jnp.maximum(y, 0.0)


if __name__ == "__main__":
    N, C_IN, C_OUT, L = 2, 4, 8, 16

    key = jax.random.PRNGKey(0)
    kx, kw, kb, kg, kbe = jax.random.split(key, 5)

    x = jax.random.normal(kx, (N, C_IN, L), dtype=jnp.float32)
    # Conv1d weight in PyTorch layout (out_channels, in_channels, kernel_size)
    w = 0.2 * jax.random.normal(kw, (C_OUT, C_IN, 3), dtype=jnp.float32)
    b = 0.1 * jax.random.normal(kb, (C_OUT,), dtype=jnp.float32)
    gamma = 1.0 + 0.1 * jax.random.normal(kg, (C_OUT,), dtype=jnp.float32)
    beta = 0.1 * jax.random.normal(kbe, (C_OUT,), dtype=jnp.float32)

    out = compact_layer_forward(x, w, b, gamma, beta)   # bf16 MXU operands, f32 output
    out = jax.block_until_ready(out)

    ref = reference_forward(x, w, b, gamma, beta)
    assert out.shape == (N, C_OUT, L)
    # bf16 operands (f32 accumulation) -> compare to the f32 reference with a bf16-level tolerance
    assert jnp.allclose(out, ref, atol=2e-2, rtol=2e-2), "mismatch vs reference"

    print("KERNEL_OK")
</pallas_src>

<mosaic_0001>
module attributes {stable_mosaic.version = 11 : i64} {
  func.func @_stats_kernel(%arg0: i32, %arg1: memref<16x16xbf16, #tpu.memory_space<vmem>>, %arg2: memref<16x128xbf16, #tpu.memory_space<vmem>>, %arg3: memref<8x128xf32, #tpu.memory_space<vmem>>) attributes {dimension_semantics = [#tpu.dimension_semantics<parallel>], iteration_bounds = array<i64: 2>, scalar_prefetch = 0 : i64, scratch_operands = 0 : i64, tpu.core_type = #tpu.core_type<tc>, window_params = [{transform_indices = @transform_0, window_bounds = array<i64: 16, 16>}, {pipeline_mode = #tpu.pipeline_mode<synchronous>, transform_indices = @transform_1, window_bounds = array<i64: 16, 128>}, {transform_indices = @transform_2, window_bounds = array<i64: 8, 128>}]} {
    %c0 = arith.constant 0 : index
    %c0_0 = arith.constant 0 : index
    %0 = vector.load %arg1[%c0, %c0_0] : memref<16x16xbf16, #tpu.memory_space<vmem>>, vector<16x16xbf16>
    %c0_1 = arith.constant 0 : index
    %c0_2 = arith.constant 0 : index
    %1 = vector.load %arg2[%c0_1, %c0_2] : memref<16x128xbf16, #tpu.memory_space<vmem>>, vector<16x128xbf16>
    %cst = arith.constant dense<0.000000e+00> : vector<16x128xf32>
    %2 = tpu.matmul %0, %1, %cst {dimension_numbers = #tpu.dot_dimension_numbers<[1], [0], [0], [1], [0, 0, 1, 1], [], []>} : vector<16x16xbf16>, vector<16x128xbf16>, vector<16x128xf32> -> vector<16x128xf32>
    %cst_3 = arith.constant dense<0.000000e+00> : vector<128xf32>
    %3 = vector.multi_reduction <add>, %2, %cst_3 [0] : vector<16x128xf32> to vector<128xf32>
    %4 = vector.shape_cast %3 : vector<128xf32> to vector<1x128xf32>
    %c0_4 = arith.constant 0 : index
    %c0_5 = arith.constant 0 : index
    %5 = vector.load %arg3[%c0_4, %c0_5] : memref<8x128xf32, #tpu.memory_space<vmem>>, vector<1x128xf32>
    tpu.vector_store %arg3[%c0_4, %c0_5], %4 {strides = array<i32>} : memref<8x128xf32, #tpu.memory_space<vmem>>, vector<1x128xf32>,
    %6 = arith.mulf %2, %2 : vector<16x128xf32>
    %cst_6 = arith.constant dense<0.000000e+00> : vector<128xf32>
    %7 = vector.multi_reduction <add>, %6, %cst_6 [0] : vector<16x128xf32> to vector<128xf32>
    %8 = vector.shape_cast %7 : vector<128xf32> to vector<1x128xf32>
    %c1 = arith.constant 1 : index
    %c0_7 = arith.constant 0 : index
    %9 = vector.load %arg3[%c1, %c0_7] : memref<8x128xf32, #tpu.memory_space<vmem>>, vector<1x128xf32>
    tpu.vector_store %arg3[%c1, %c0_7], %8 {strides = array<i32>} : memref<8x128xf32, #tpu.memory_space<vmem>>, vector<1x128xf32>,
    return
  }
  func.func @transform_0(%arg0: i32) -> (i32, i32) {
    %c0_i32 = arith.constant 0 : i32
    %c0_i32_0 = arith.constant 0 : i32
    return %arg0, %c0_i32 : i32, i32
  }
  func.func @transform_1(%arg0: i32) -> (i32, i32) {
    %c0_i32 = arith.constant 0 : i32
    %c0_i32_0 = arith.constant 0 : i32
    %c0_i32_1 = arith.constant 0 : i32
    return %c0_i32, %c0_i32_0 : i32, i32
  }
  func.func @transform_2(%arg0: i32) -> (i32, i32) {
    %c0_i32 = arith.constant 0 : i32
    %c0_i32_0 = arith.constant 0 : i32
    return %arg0, %c0_i32 : i32, i32
  }
}

module attributes {stable_mosaic.version = 11 : i64} {
  func.func @_conv_affine_relu_kernel(%arg0: i32, %arg1: memref<16x16xbf16, #tpu.memory_space<vmem>>, %arg2: memref<16x128xbf16, #tpu.memory_space<vmem>>, %arg3: memref<1x128xf32, #tpu.memory_space<vmem>>, %arg4: memref<1x128xf32, #tpu.memory_space<vmem>>, %arg5: memref<16x128xf32, #tpu.memory_space<vmem>>) attributes {dimension_semantics = [#tpu.dimension_semantics<parallel>], iteration_bounds = array<i64: 2>, scalar_prefetch = 0 : i64, scratch_operands = 0 : i64, tpu.core_type = #tpu.core_type<tc>, window_params = [{transform_indices = @transform_0, window_bounds = array<i64: 16, 16>}, {pipeline_mode = #tpu.pipeline_mode<synchronous>, transform_indices = @transform_1, window_bounds = array<i64: 16, 128>}, {pipeline_mode = #tpu.pipeline_mode<synchronous>, transform_indices = @transform_2, window_bounds = array<i64: 1, 128>}, {pipeline_mode = #tpu.pipeline_mode<synchronous>, transform_indices = @transform_3, window_bounds = array<i64: 1, 128>}, {transform_indices = @transform_4, window_bounds = array<i64: 16, 128>}]} {
    %c0 = arith.constant 0 : index
    %c0_0 = arith.constant 0 : index
    %0 = vector.load %arg1[%c0, %c0_0] : memref<16x16xbf16, #tpu.memory_space<vmem>>, vector<16x16xbf16>
    %c0_1 = arith.constant 0 : index
    %c0_2 = arith.constant 0 : index
    %1 = vector.load %arg2[%c0_1, %c0_2] : memref<16x128xbf16, #tpu.memory_space<vmem>>, vector<16x128xbf16>
    %cst = arith.constant dense<0.000000e+00> : vector<16x128xf32>
    %2 = tpu.matmul %0, %1, %cst {dimension_numbers = #tpu.dot_dimension_numbers<[1], [0], [0], [1], [0, 0, 1, 1], [], []>} : vector<16x16xbf16>, vector<16x128xbf16>, vector<16x128xf32> -> vector<16x128xf32>
    %c0_3 = arith.constant 0 : index
    %c0_4 = arith.constant 0 : index
    %3 = vector.load %arg3[%c0_3, %c0_4] : memref<1x128xf32, #tpu.memory_space<vmem>>, vector<1x128xf32>
    %4 = vector.broadcast %3 : vector<1x128xf32> to vector<16x128xf32>
    %5 = arith.mulf %2, %4 : vector<16x128xf32>
    %c0_5 = arith.constant 0 : index
    %c0_6 = arith.constant 0 : index
    %6 = vector.load %arg4[%c0_5, %c0_6] : memref<1x128xf32, #tpu.memory_space<vmem>>, vector<1x128xf32>
    %7 = vector.broadcast %6 : vector<1x128xf32> to vector<16x128xf32>
    %8 = arith.addf %5, %7 : vector<16x128xf32>
    %cst_7 = arith.constant 0.000000e+00 : f32
    %9 = vector.broadcast %cst_7 : f32 to vector<16x128xf32>
    %10 = arith.maximumf %8, %9 : vector<16x128xf32>
    %c0_8 = arith.constant 0 : index
    %c0_9 = arith.constant 0 : index
    %11 = vector.load %arg5[%c0_8, %c0_9] : memref<16x128xf32, #tpu.memory_space<vmem>>, vector<16x128xf32>
    tpu.vector_store %arg5[%c0_8, %c0_9], %10 {strides = array<i32>} : memref<16x128xf32, #tpu.memory_space<vmem>>, vector<16x128xf32>,
    return
  }
  func.func @transform_0(%arg0: i32) -> (i32, i32) {
    %c0_i32 = arith.constant 0 : i32
    %c0_i32_0 = arith.constant 0 : i32
    return %arg0, %c0_i32 : i32, i32
  }
  func.func @transform_1(%arg0: i32) -> (i32, i32) {
    %c0_i32 = arith.constant 0 : i32
    %c0_i32_0 = arith.constant 0 : i32
    %c0_i32_1 = arith.constant 0 : i32
    return %c0_i32, %c0_i32_0 : i32, i32
  }
  func.func @transform_2(%arg0: i32) -> (i32, i32) {
    %c0_i32 = arith.constant 0 : i32
    %c0_i32_0 = arith.constant 0 : i32
    %c0_i32_1 = arith.constant 0 : i32
    return %c0_i32, %c0_i32_0 : i32, i32
  }
  func.func @transform_3(%arg0: i32) -> (i32, i32) {
    %c0_i32 = arith.constant 0 : i32
    %c0_i32_0 = arith.constant 0 : i32
    %c0_i32_1 = arith.constant 0 : i32
    return %c0_i32, %c0_i32_0 : i32, i32
  }
  func.func @transform_4(%arg0: i32) -> (i32, i32) {
    %c0_i32 = arith.constant 0 : i32
    %c0_i32_0 = arith.constant 0 : i32
    return %arg0, %c0_i32 : i32, i32
  }
}

</mosaic_0001>

<bundles_post_ra>
// kernel: compact_layer_forward.3
= control target key start
LH: loop header
LB: loop body
LE: loop exit
PB: predicated region body
PF: predicated region fallthrough
CT: control target
= control target key end

     0   :  { %s411_s15 = smov 0   ;;  %s437_s0 = inlined_call_operand.vmem [shape: bf16[32,16], index: 0, kind: input, shape index: {}]   ;;  %s438_s1 = inlined_call_operand.vmem [shape: bf16[16,128], index: 1, kind: input, shape index: {}]   ;;  %s439_s2 = inlined_call_operand.vmem [shape: f32[1,128], index: 2, kind: input, shape index: {}]   ;;  %s440_s3 = inlined_call_operand.vmem [shape: f32[1,128], index: 3, kind: input, shape index: {}]   ;;  %s441_s4 = inlined_call_operand.vmem [shape: f32[32,128], index: 4, kind: output, shape index: {}]  }
   0x1 LB: > { %s340_s16 = sadd.s32 4294967295, %s382_s15   ;;  %p344_p0 = scmp.ge.s32.totalorder %s382_s15, 1  ;;  %s382_s15 = sphi %s411_s15, %s14_s15  }
   0x2   : > { %p163_p1 = scmp.lt.s32.totalorder %s382_s15, 3 }
   0x4   : > { %p164_p2 = pnand %p344_p0, %p163_p1 }
   0x5   : > { %v374_v0 = vld [vmem:[%s438_s1] sm:$0xff] (!%p164_p2)   ;;  %v384_v1 = vmov (!%p164_p2), 0.0   ;;  %s345_s19 = sshll.u32 (!%p164_p2), %s340_s16, 1  ;;  %vm385_vm0 = vmmov (!%p164_p2), 0   ;;  %vm217_vm1 = vcmask (!%p164_p2), 130048  }
   0x6   : > { %167 = sbr.rel (%p164_p2) target bundleno = 238 (0xee), region = 36  ;;  %358 = vmatprep.subr.bf16.mxu0 (!%p164_p2), %v384_v1  ;;  %360 = vmatprep.mubr.msk.bf16.mxu0 (!%p164_p2), %vm385_vm0, %v384_v1  ;;  %p190_p3 = scmp.lt.s32.totalorder (!%p164_p2), %s345_s19, 3  ;;  %v352_v3 = vld [vmem:[%s439_s2] ss:$0 sm:$0xff] (!%p164_p2) }
   0x7   : > { %359 = vmatpush3.bf16.msra.mxu0 (!%p164_p2), %v374_v0  ;;  %v353_v5 = vld [vmem:[%s440_s3] ss:$0 sm:$0xff] (!%p164_p2) }
   0xd   : > { %s443_s19 = smov (!%p190_p3, %s345_s19), 3 }
   0xe   : > { %s346_s20 = sshll.u32 %s443_s19, 2  ;;  %s348_s28 = sshll.u32 %s443_s19, 3 }
   0xf   : > { %s193_s23 = scalar_lea.vmem %s437_s0, %s346_s20  ;;  %s199_s5 = scalar_lea.vmem %s441_s4, %s348_s28 }
  0x10   : > { %v375_v2 = vld [vmem:[%s193_s23] sm:$0xff]  }
  0x11   : > { %361 = vmatmul.mubr.msk.bf16.vlgmr.msra.gmra.mrb[0].mxu0 %vm217_vm1, %v375_v2 }
  0xe4   : > { %v255_v4 = vpop.f32.mrb[0].mxu0 }
  0xe5   : > { %v269_v6 = vmul.f32 %v352_v3, %v255_v4  ;;  %v362_v7 = vpop.f32.mrb[1].mxu0 }
  0xe6   : > { %v258_v8 = vpop.f32.mrb[2].mxu0 }
  0xe7   : > { %v278_v9 = vadd.f32 %v353_v5, %v269_v6  ;;  %v270_v10 = vmul.f32 %v352_v3, %v258_v8  ;;  %v363_v11 = vpop.f32.mrb[3].mxu0 }
  0xe9   : > { %v280_v12 = vmax.f32 %v278_v9, 0.0  ;;  %v279_v13 = vadd.f32 %v353_v5, %v270_v10 }
  0xeb   : > { %282 = vst [vmem:[%s199_s5] sm:$0xff] %v280_v12  ;;  %v281_v14 = vmax.f32 %v279_v13, 0.0 }
  0xed   : > { %283 = vst [vmem:[%s199_s5 + $0x8] sm:$0xff] %v281_v14 }
  0xee PF: > { %s14_s15 = sadd.s32 1, %s382_s15  }
  0xef   : > { %p11_p4 = scmp.ge.s32.totalorder %s14_s15, 4  }
  0xf1   :  { %13 = sbr.rel (!%p11_p4) target bundleno = 1 (0x1), region = 66 }

// kernel: compact_layer_forward.2
= control target key start
LH: loop header
LB: loop body
LE: loop exit
PB: predicated region body
PF: predicated region fallthrough
CT: control target
= control target key end

     0   :  { %s334_s9 = smov 0   ;;  %s354_s0 = inlined_call_operand.vmem [shape: bf16[32,16], index: 0, kind: input, shape index: {}]   ;;  %s355_s1 = inlined_call_operand.vmem [shape: bf16[16,128], index: 1, kind: input, shape index: {}]   ;;  %s356_s2 = inlined_call_operand.vmem [shape: f32[16,128], index: 2, kind: output, shape index: {}]  }
   0x1 LB: > { %s276_s10 = sadd.s32 4294967295, %s315_s9   ;;  %p280_p0 = scmp.ge.s32.totalorder %s315_s9, 1  ;;  %s315_s9 = sphi %s334_s9, %s12_s9  }
   0x2   : > { %p113_p1 = scmp.lt.s32.totalorder %s315_s9, 3 }
   0x4   : > { %p114_p2 = pnand %p280_p0, %p113_p1 }
   0x5   : > { %v307_v0 = vld [vmem:[%s355_s1] sm:$0xff] (!%p114_p2)   ;;  %v317_v1 = vmov (!%p114_p2), 0.0   ;;  %s281_s13 = sshll.u32 (!%p114_p2), %s276_s10, 1  ;;  %vm318_vm0 = vmmov (!%p114_p2), 0   ;;  %vm160_vm1 = vcmask (!%p114_p2), 130048   ;;  %p140_p4 = scmp.lt.s32.totalorder (!%p114_p2), %s276_s10, 1 }
   0x6   : > { %117 = sbr.rel (%p114_p2) target bundleno = 248 (0xf8), region = 28  ;;  %291 = vmatprep.subr.bf16.mxu0 (!%p114_p2), %v317_v1  ;;  %293 = vmatprep.mubr.msk.bf16.mxu0 (!%p114_p2), %vm318_vm0, %v317_v1  ;;  %p135_p3 = scmp.lt.s32.totalorder (!%p114_p2), %s281_s13, 3 }
   0x7   : > { %292 = vmatpush3.bf16.msra.mxu0 (!%p114_p2), %v307_v0 }
   0xd   : > { %s358_s13 = smov (!%p135_p3, %s281_s13), 3  ;;  %s360_s10 = smov (!%p140_p4, %s276_s10), 1 }
   0xe   : > { %s282_s14 = sshll.u32 %s358_s13, 2  ;;  %s283_s18 = sshll.u32 %s360_s10, 3 }
   0xf   : > { %s138_s17 = scalar_lea.vmem %s354_s0, %s282_s14  ;;  %s143_s21 = scalar_lea.vmem %s356_s2, %s283_s18 }
  0x10   : > { %v308_v2 = vld [vmem:[%s138_s17] sm:$0xff]  }
  0x11   : > { %294 = vmatmul.mubr.msk.bf16.vlgmr.msra.gmra.mrb[0].mxu0 %vm160_vm1, %v308_v2 }
  0xe4   : > { %v198_v3 = vpop.f32.mrb[0].mxu0 }
  0xe5   : > { %v295_v4 = vpop.f32.mrb[1].mxu0  ;;  %v213_v6 = vmul.f32 %v198_v3, %v198_v3 }
  0xe6   : > { %v201_v5 = vpop.f32.mrb[2].mxu0 }
  0xe7   : > { %v205_v7 = vadd.f32 %v201_v5, %v198_v3  ;;  %v214_v8 = vmul.f32 %v201_v5, %v201_v5  ;;  %v296_v9 = vpop.f32.mrb[3].mxu0 }
  0xe9   : > { %v206_v10 = vrot.slane %v205_v7, 4  ;;  %v215_v11 = vadd.f32 %v214_v8, %v213_v6 }
  0xeb   : > { %v207_v12 = vadd.f32 %v206_v10, %v205_v7  ;;  %v216_v13 = vrot.slane %v215_v11, 4 }
  0xed   : > { %v208_v14 = vrot.slane %v207_v12, 2  ;;  %v217_v15 = vadd.f32 %v216_v13, %v215_v11 }
  0xef   : > { %v209_v16 = vadd.f32 %v208_v14, %v207_v12  ;;  %v218_v17 = vrot.slane %v217_v15, 2 }
  0xf1   : > { %v210_v18 = vrot.slane %v209_v16, 1  ;;  %v219_v19 = vadd.f32 %v218_v17, %v217_v15 }
  0xf3   : > { %v211_v20 = vadd.f32 %v210_v18, %v209_v16  ;;  %v220_v21 = vrot.slane %v219_v19, 1 }
  0xf5   : > { %212 = vst [vmem:[%s143_s21] sm:$0x1] %v211_v20  ;;  %v221_v22 = vadd.f32 %v220_v21, %v219_v19 }
  0xf7   : > { %222 = vst [vmem:[%s143_s21 + $0x1] sm:$0x1] %v221_v22 }
  0xf8 PF: > { %s12_s9 = sadd.s32 1, %s315_s9  }
  0xf9   : > { %p9_p5 = scmp.ge.s32.totalorder %s12_s9, 4  }
  0xfb   :  { %11 = sbr.rel (!%p9_p5) target bundleno = 1 (0x1), region = 58 }

</bundles_post_ra>
